<compile_context>
chip_gen: v6e
topology: v6e:2x2x1
jax: 0.10.0
libtpu: 0.0.40
codegen_flags: <defaults>
</compile_context>

<pallas_src>
import functools
import math

import jax
import jax.numpy as jnp
from jax.experimental import pallas as pl
from jax.experimental.pallas import tpu as pltpu


def kernel_size(in_channel):
    k = int((math.log2(in_channel) + 1) // 2)
    return k + 1 if k % 2 == 0 else k


def _round_down(x, m):
    return (x // m) * m


def _round_up(x, m):
    return ((x + m - 1) // m) * m


def _pick_rows_tile(R):
    """Sublane-aligned rows tile: <=64 (vreg pressure), >=2 blocks when possible."""
    if R <= 8:
        return R                       # block == full dim is always legal
    if R < 16:
        return 8
    return max(8, min(64, _round_down(R // 2, 8)))


def _pick_hw_tile(HW, rows_tile, max_block_elems=512 * 1024, max_tile=8192):
    """Lane-aligned HW tile under a per-input block budget (~2 MiB f32)."""
    if HW < 128:
        return HW                      # single narrow block (== full dim)
    cap = max(128, min(_round_down(max_block_elems // max(rows_tile, 1), 128),
                       max_tile))
    # Prefer an exact 128-multiple divisor of HW (no masked tail at all).
    for t in range(cap, 127, -128):
        if HW % t == 0:
            return t
    # Otherwise: balanced 128-aligned tiles + in-kernel lane mask on the tail.
    n = max(1, pl.cdiv(HW, cap))
    t = _round_up(pl.cdiv(HW, n), 128)
    while t > cap or t > HW:
        n += 1
        t = _round_up(pl.cdiv(HW, n), 128)
    return t


# ---------------------------------------------------------------------------
# Fused pooling kernel: 2-D grid (rows = B*C  ->  "parallel",
#                                 HW tiles    ->  "arbitrary", reduction last).
# Per-lane f32 partials live in VMEM scratch; within one grid step they are
# carried in registers (read scratch once, write once).  Cross-lane reduce and
# the 1/HW scale happen once, in the pl.when(last) epilogue.
# ---------------------------------------------------------------------------
def _fused_pool_kernel(x1_ref, x2_ref,
                       avg1_ref, max1_ref, avg2_ref, max2_ref,
                       s1_acc, m1_acc, s2_acc, m2_acc,
                       *, hw_total, needs_mask):
    h = pl.program_id(1)
    last_h = pl.num_programs(1) - 1

    rows, hw_tile = x1_ref.shape
    acc_w = s1_acc.shape[1]            # 128, or HW itself when HW < 128
    n_chunks = hw_tile // acc_w

    @pl.when(h == 0)
    def _init():
        s1_acc[...] = jnp.zeros_like(s1_acc)
        s2_acc[...] = jnp.zeros_like(s2_acc)
        m1_acc[...] = jnp.full_like(m1_acc, -jnp.inf)
        m2_acc[...] = jnp.full_like(m2_acc, -jnp.inf)

    # Register-carried partials for this grid step.
    s1 = s1_acc[...]
    s2 = s2_acc[...]
    m1 = m1_acc[...]
    m2 = m2_acc[...]

    if needs_mask:
        # Hoisted once per grid step (JAX does not CSE broadcast_in_dim).
        lane = jax.lax.broadcasted_iota(jnp.int32, (rows, acc_w), 1)
        remaining = hw_total - h * hw_tile       # scalar; can go negative (all-false)
        neg_inf = jnp.float32(-jnp.inf)

    # Per-chunk loads directly off the refs: live range ~2 chunks, not the tile.
    for c in range(n_chunks):
        lo = c * acc_w
        c1 = x1_ref[:, lo:lo + acc_w].astype(jnp.float32)
        c2 = x2_ref[:, lo:lo + acc_w].astype(jnp.float32)
        if needs_mask:
            valid = lane < (remaining - lo)      # pure VPU select, no jnp.pad copies
            s1 = s1 + jnp.where(valid, c1, 0.0)
            s2 = s2 + jnp.where(valid, c2, 0.0)
            m1 = jnp.maximum(m1, jnp.where(valid, c1, neg_inf))
            m2 = jnp.maximum(m2, jnp.where(valid, c2, neg_inf))
        else:
            s1 = s1 + c1
            s2 = s2 + c2
            m1 = jnp.maximum(m1, c1)
            m2 = jnp.maximum(m2, c2)

    s1_acc[...] = s1
    s2_acc[...] = s2
    m1_acc[...] = m1
    m2_acc[...] = m2

    @pl.when(h == last_h)
    def _finalize():
        inv_hw = jnp.float32(1.0 / hw_total)     # scale only once, at finalize
        avg1_ref[...] = jnp.sum(s1_acc[...], axis=1, keepdims=True) * inv_hw
        avg2_ref[...] = jnp.sum(s2_acc[...], axis=1, keepdims=True) * inv_hw
        max1_ref[...] = jnp.max(m1_acc[...], axis=1, keepdims=True)
        max2_ref[...] = jnp.max(m2_acc[...], axis=1, keepdims=True)


def fused_global_pool(t1, t2):
    """(B,C,H,W) x2 -> (avg1, max1, avg2, max2), each (B, C) float32."""
    B, C, H, W = t1.shape
    R, HW = B * C, H * W
    x1 = t1.reshape(R, HW)
    x2 = t2.reshape(R, HW)

    rows_tile = _pick_rows_tile(R)
    hw_tile = _pick_hw_tile(HW, rows_tile)
    acc_w = min(128, hw_tile)
    needs_mask = (HW % hw_tile) != 0
    grid = (pl.cdiv(R, rows_tile), pl.cdiv(HW, hw_tile))

    in_spec = pl.BlockSpec((rows_tile, hw_tile), lambda r, h: (r, h))
    out_spec = pl.BlockSpec((rows_tile, 1), lambda r, h: (r, 0))
    out_sds = jax.ShapeDtypeStruct((R, 1), jnp.float32)

    itemsize = jnp.dtype(t1.dtype).itemsize
    cost = pl.CostEstimate(
        flops=4 * R * HW,                                   # 2 tensors x (sum + max)
        transcendentals=0,
        bytes_accessed=2 * R * HW * itemsize + 4 * R * 4)

    avg1, mx1, avg2, mx2 = pl.pallas_call(
        functools.partial(_fused_pool_kernel, hw_total=HW, needs_mask=needs_mask),
        grid=grid,
        out_shape=(out_sds, out_sds, out_sds, out_sds),
        in_specs=[in_spec, in_spec],
        out_specs=(out_spec, out_spec, out_spec, out_spec),
        scratch_shapes=[pltpu.VMEM((rows_tile, acc_w), jnp.float32)   # sum t1
                        for _ in range(4)] ,                          # max t1, sum t2, max t2
        compiler_params=pltpu.CompilerParams(
            dimension_semantics=("parallel", "arbitrary")),
        cost_estimate=cost,
    )(x1, x2)

    return (avg1.reshape(B, C), mx1.reshape(B, C),
            avg2.reshape(B, C), mx2.reshape(B, C))


# ---------------------------------------------------------------------------
# Full forward
# ---------------------------------------------------------------------------
def channel_attention(t1, t2, w1, b1, w2, b2, k):
    """Pallas implementation of ChannelAttention.forward -> (2, B, C, 1, 1)."""
    B, C, H, W = t1.shape

    avg1, max1, avg2, max2 = fused_global_pool(t1, t2)

    # Tiny head (2*B*C elements) in plain JAX.
    pool = jnp.stack([avg1, max1, avg2, max2], axis=1)            # (B, 4, C)
    pad = k // 2
    pp = jnp.pad(pool, ((0, 0), (0, 0), (pad, pad)))              # (B, 4, C+k-1)

    def conv1d(w, b):                                             # Conv1d(4->1, k)
        out = jnp.zeros((B, C), jnp.float32)
        for i in range(4):
            for j in range(k):
                out = out + w[i, j] * pp[:, i, j:j + C]
        return out + b[0]

    a1 = conv1d(w1, b1)
    a2 = conv1d(w2, b2)
    st = jnp.stack([a1, a2], axis=0)                              # (2, B, C)
    sm = jax.nn.softmax(st, axis=0)
    # torch: stack -> softmax(dim=0) -> transpose(-1,-2) -> unsqueeze(-1)
    return sm[:, :, :, None, None]                                # (2, B, C, 1, 1)


# ---------------------------------------------------------------------------
# Pure-JAX reference (correctness check)
# ---------------------------------------------------------------------------
def reference(t1, t2, w1, b1, w2, b2, k):
    avg1 = t1.mean(axis=(2, 3)); max1 = t1.max(axis=(2, 3))
    avg2 = t2.mean(axis=(2, 3)); max2 = t2.max(axis=(2, 3))
    pool = jnp.stack([avg1, max1, avg2, max2], axis=1)  # (B, 4, C)
    B, _, C = pool.shape
    pad = k // 2
    pp = jnp.pad(pool, ((0, 0), (0, 0), (pad, pad)))

    def conv1d(w, b):
        out = jnp.zeros((B, C), jnp.float32)
        for i in range(4):
            for j in range(k):
                out = out + w[i, j] * pp[:, i, j:j + C]
        return out + b[0]

    a1 = conv1d(w1, b1)
    a2 = conv1d(w2, b2)
    st = jnp.stack([a1, a2], axis=0)
    sm = jax.nn.softmax(st, axis=0)
    return sm[:, :, :, None, None]


if __name__ == "__main__":
    def run_case(B, C, H, W, seed):
        k = kernel_size(C)
        key = jax.random.PRNGKey(seed)
        k1, k2, k3, k4, k5, k6 = jax.random.split(key, 6)
        t1 = jax.random.normal(k1, (B, C, H, W), jnp.float32)
        t2 = jax.random.normal(k2, (B, C, H, W), jnp.float32)
        bound = 1.0 / math.sqrt(4 * k)                 # PyTorch Conv1d init bound
        w1 = jax.random.uniform(k3, (4, k), jnp.float32, -bound, bound)
        b1 = jax.random.uniform(k4, (1,), jnp.float32, -bound, bound)
        w2 = jax.random.uniform(k5, (4, k), jnp.float32, -bound, bound)
        b2 = jax.random.uniform(k6, (1,), jnp.float32, -bound, bound)

        ca = jax.jit(channel_attention, static_argnums=(6,))
        out = jax.block_until_ready(ca(t1, t2, w1, b1, w2, b2, k))
        ref = reference(t1, t2, w1, b1, w2, b2, k)
        assert out.shape == (2, B, C, 1, 1), out.shape
        assert jnp.allclose(out, ref, atol=1e-5, rtol=1e-5), \
            f"mismatch vs reference for shape {(B, C, H, W)}"

    run_case(2, 16, 16, 16, 0)   # primary demo shape (aligned, HW=256, R=32)
    run_case(2, 13, 20, 20, 1)   # partial row blocks + masked HW tail (HW=400)
    run_case(1, 12, 7, 7, 2)     # HW < 128 path (single narrow lane block)

    print("KERNEL_OK")
</pallas_src>

<mosaic_0001>
module attributes {stable_mosaic.version = 11 : i64} {
  func.func @_fused_pool_kernel(%arg0: i32, %arg1: i32, %arg2: memref<16x256xf32, #tpu.memory_space<vmem>>, %arg3: memref<16x256xf32, #tpu.memory_space<vmem>>, %arg4: memref<16x1xf32, #tpu.memory_space<vmem>>, %arg5: memref<16x1xf32, #tpu.memory_space<vmem>>, %arg6: memref<16x1xf32, #tpu.memory_space<vmem>>, %arg7: memref<16x1xf32, #tpu.memory_space<vmem>>, %arg8: memref<16x128xf32, #tpu.memory_space<vmem>>, %arg9: memref<16x128xf32, #tpu.memory_space<vmem>>, %arg10: memref<16x128xf32, #tpu.memory_space<vmem>>, %arg11: memref<16x128xf32, #tpu.memory_space<vmem>>) attributes {dimension_semantics = [#tpu.dimension_semantics<parallel>, #tpu.dimension_semantics<arbitrary>], iteration_bounds = array<i64: 2, 1>, scalar_prefetch = 0 : i64, scratch_operands = 4 : i64, tpu.core_type = #tpu.core_type<tc>, window_params = [{transform_indices = @transform_0, window_bounds = array<i64: 16, 256>}, {transform_indices = @transform_1, window_bounds = array<i64: 16, 256>}, {transform_indices = @transform_2, window_bounds = array<i64: 16, 1>}, {transform_indices = @transform_3, window_bounds = array<i64: 16, 1>}, {transform_indices = @transform_4, window_bounds = array<i64: 16, 1>}, {transform_indices = @transform_5, window_bounds = array<i64: 16, 1>}]} {
    %c0_i32 = arith.constant 0 : i32
    %0 = arith.cmpi eq, %arg1, %c0_i32 : i32
    %1 = arith.extui %0 : i1 to i32
    %c0_i32_0 = arith.constant 0 : i32
    %2 = arith.cmpi ne, %1, %c0_i32_0 : i32
    scf.if %2 {
      %cst = arith.constant 0.000000e+00 : f32
      %26 = vector.broadcast %cst : f32 to vector<16x128xf32>
      %c0_25 = arith.constant 0 : index
      %c0_26 = arith.constant 0 : index
      %27 = vector.load %arg8[%c0_25, %c0_26] : memref<16x128xf32, #tpu.memory_space<vmem>>, vector<16x128xf32>
      tpu.vector_store %arg8[%c0_25, %c0_26], %26 {strides = array<i32>} : memref<16x128xf32, #tpu.memory_space<vmem>>, vector<16x128xf32>,
      %cst_27 = arith.constant 0.000000e+00 : f32
      %28 = vector.broadcast %cst_27 : f32 to vector<16x128xf32>
      %c0_28 = arith.constant 0 : index
      %c0_29 = arith.constant 0 : index
      %29 = vector.load %arg10[%c0_28, %c0_29] : memref<16x128xf32, #tpu.memory_space<vmem>>, vector<16x128xf32>
      tpu.vector_store %arg10[%c0_28, %c0_29], %28 {strides = array<i32>} : memref<16x128xf32, #tpu.memory_space<vmem>>, vector<16x128xf32>,
      %cst_30 = arith.constant 0xFF800000 : f32
      %30 = vector.broadcast %cst_30 : f32 to vector<16x128xf32>
      %c0_31 = arith.constant 0 : index
      %c0_32 = arith.constant 0 : index
      %31 = vector.load %arg9[%c0_31, %c0_32] : memref<16x128xf32, #tpu.memory_space<vmem>>, vector<16x128xf32>
      tpu.vector_store %arg9[%c0_31, %c0_32], %30 {strides = array<i32>} : memref<16x128xf32, #tpu.memory_space<vmem>>, vector<16x128xf32>,
      %cst_33 = arith.constant 0xFF800000 : f32
      %32 = vector.broadcast %cst_33 : f32 to vector<16x128xf32>
      %c0_34 = arith.constant 0 : index
      %c0_35 = arith.constant 0 : index
      %33 = vector.load %arg11[%c0_34, %c0_35] : memref<16x128xf32, #tpu.memory_space<vmem>>, vector<16x128xf32>
      tpu.vector_store %arg11[%c0_34, %c0_35], %32 {strides = array<i32>} : memref<16x128xf32, #tpu.memory_space<vmem>>, vector<16x128xf32>,
    } else {
    }
    %c0 = arith.constant 0 : index
    %c0_1 = arith.constant 0 : index
    %3 = vector.load %arg8[%c0, %c0_1] : memref<16x128xf32, #tpu.memory_space<vmem>>, vector<16x128xf32>
    %c0_2 = arith.constant 0 : index
    %c0_3 = arith.constant 0 : index
    %4 = vector.load %arg10[%c0_2, %c0_3] : memref<16x128xf32, #tpu.memory_space<vmem>>, vector<16x128xf32>
    %c0_4 = arith.constant 0 : index
    %c0_5 = arith.constant 0 : index
    %5 = vector.load %arg9[%c0_4, %c0_5] : memref<16x128xf32, #tpu.memory_space<vmem>>, vector<16x128xf32>
    %c0_6 = arith.constant 0 : index
    %c0_7 = arith.constant 0 : index
    %6 = vector.load %arg11[%c0_6, %c0_7] : memref<16x128xf32, #tpu.memory_space<vmem>>, vector<16x128xf32>
    %c0_8 = arith.constant 0 : index
    %c0_9 = arith.constant 0 : index
    %7 = vector.load %arg2[%c0_8, %c0_9] : memref<16x256xf32, #tpu.memory_space<vmem>>, vector<16x128xf32>
    %c0_10 = arith.constant 0 : index
    %c0_11 = arith.constant 0 : index
    %8 = vector.load %arg3[%c0_10, %c0_11] : memref<16x256xf32, #tpu.memory_space<vmem>>, vector<16x128xf32>
    %9 = arith.addf %3, %7 : vector<16x128xf32>
    %10 = arith.addf %4, %8 : vector<16x128xf32>
    %11 = arith.maximumf %5, %7 : vector<16x128xf32>
    %12 = arith.maximumf %6, %8 : vector<16x128xf32>
    %c0_12 = arith.constant 0 : index
    %c128 = arith.constant 128 : index
    %13 = vector.load %arg2[%c0_12, %c128] : memref<16x256xf32, #tpu.memory_space<vmem>>, vector<16x128xf32>
    %c0_13 = arith.constant 0 : index
    %c128_14 = arith.constant 128 : index
    %14 = vector.load %arg3[%c0_13, %c128_14] : memref<16x256xf32, #tpu.memory_space<vmem>>, vector<16x128xf32>
    %15 = arith.addf %9, %13 : vector<16x128xf32>
    %16 = arith.addf %10, %14 : vector<16x128xf32>
    %17 = arith.maximumf %11, %13 : vector<16x128xf32>
    %18 = arith.maximumf %12, %14 : vector<16x128xf32>
    %c0_15 = arith.constant 0 : index
    %c0_16 = arith.constant 0 : index
    %19 = vector.load %arg8[%c0_15, %c0_16] : memref<16x128xf32, #tpu.memory_space<vmem>>, vector<16x128xf32>
    tpu.vector_store %arg8[%c0_15, %c0_16], %15 {strides = array<i32>} : memref<16x128xf32, #tpu.memory_space<vmem>>, vector<16x128xf32>,
    %c0_17 = arith.constant 0 : index
    %c0_18 = arith.constant 0 : index
    %20 = vector.load %arg10[%c0_17, %c0_18] : memref<16x128xf32, #tpu.memory_space<vmem>>, vector<16x128xf32>
    tpu.vector_store %arg10[%c0_17, %c0_18], %16 {strides = array<i32>} : memref<16x128xf32, #tpu.memory_space<vmem>>, vector<16x128xf32>,
    %c0_19 = arith.constant 0 : index
    %c0_20 = arith.constant 0 : index
    %21 = vector.load %arg9[%c0_19, %c0_20] : memref<16x128xf32, #tpu.memory_space<vmem>>, vector<16x128xf32>
    tpu.vector_store %arg9[%c0_19, %c0_20], %17 {strides = array<i32>} : memref<16x128xf32, #tpu.memory_space<vmem>>, vector<16x128xf32>,
    %c0_21 = arith.constant 0 : index
    %c0_22 = arith.constant 0 : index
    %22 = vector.load %arg11[%c0_21, %c0_22] : memref<16x128xf32, #tpu.memory_space<vmem>>, vector<16x128xf32>
    tpu.vector_store %arg11[%c0_21, %c0_22], %18 {strides = array<i32>} : memref<16x128xf32, #tpu.memory_space<vmem>>, vector<16x128xf32>,
    %c0_i32_23 = arith.constant 0 : i32
    %23 = arith.cmpi eq, %arg1, %c0_i32_23 : i32
    %24 = arith.extui %23 : i1 to i32
    %c0_i32_24 = arith.constant 0 : i32
    %25 = arith.cmpi ne, %24, %c0_i32_24 : i32
    scf.if %25 {
      %c0_25 = arith.constant 0 : index
      %c0_26 = arith.constant 0 : index
      %26 = vector.load %arg8[%c0_25, %c0_26] : memref<16x128xf32, #tpu.memory_space<vmem>>, vector<16x128xf32>
      %cst = arith.constant dense<0.000000e+00> : vector<16xf32>
      %27 = vector.multi_reduction <add>, %26, %cst [1] : vector<16x128xf32> to vector<16xf32>
      %28 = vector.shape_cast %27 : vector<16xf32> to vector<16x1xf32>
      %cst_27 = arith.constant 3.906250e-03 : f32
      %29 = vector.broadcast %cst_27 : f32 to vector<16x1xf32>
      %30 = arith.mulf %28, %29 : vector<16x1xf32>
      %c0_28 = arith.constant 0 : index
      %c0_29 = arith.constant 0 : index
      %31 = vector.load %arg4[%c0_28, %c0_29] : memref<16x1xf32, #tpu.memory_space<vmem>>, vector<16x1xf32>
      tpu.vector_store %arg4[%c0_28, %c0_29], %30 {strides = array<i32>} : memref<16x1xf32, #tpu.memory_space<vmem>>, vector<16x1xf32>,
      %c0_30 = arith.constant 0 : index
      %c0_31 = arith.constant 0 : index
      %32 = vector.load %arg10[%c0_30, %c0_31] : memref<16x128xf32, #tpu.memory_space<vmem>>, vector<16x128xf32>
      %cst_32 = arith.constant dense<0.000000e+00> : vector<16xf32>
      %33 = vector.multi_reduction <add>, %32, %cst_32 [1] : vector<16x128xf32> to vector<16xf32>
      %34 = vector.shape_cast %33 : vector<16xf32> to vector<16x1xf32>
      %cst_33 = arith.constant 3.906250e-03 : f32
      %35 = vector.broadcast %cst_33 : f32 to vector<16x1xf32>
      %36 = arith.mulf %34, %35 : vector<16x1xf32>
      %c0_34 = arith.constant 0 : index
      %c0_35 = arith.constant 0 : index
      %37 = vector.load %arg6[%c0_34, %c0_35] : memref<16x1xf32, #tpu.memory_space<vmem>>, vector<16x1xf32>
      tpu.vector_store %arg6[%c0_34, %c0_35], %36 {strides = array<i32>} : memref<16x1xf32, #tpu.memory_space<vmem>>, vector<16x1xf32>,
      %c0_36 = arith.constant 0 : index
      %c0_37 = arith.constant 0 : index
      %38 = vector.load %arg9[%c0_36, %c0_37] : memref<16x128xf32, #tpu.memory_space<vmem>>, vector<16x128xf32>
      %cst_38 = arith.constant dense<0xFF800000> : vector<16xf32>
      %39 = vector.multi_reduction <maximumf>, %38, %cst_38 [1] : vector<16x128xf32> to vector<16xf32>
      %40 = vector.shape_cast %39 : vector<16xf32> to vector<16x1xf32>
      %c0_39 = arith.constant 0 : index
      %c0_40 = arith.constant 0 : index
      %41 = vector.load %arg5[%c0_39, %c0_40] : memref<16x1xf32, #tpu.memory_space<vmem>>, vector<16x1xf32>
      tpu.vector_store %arg5[%c0_39, %c0_40], %40 {strides = array<i32>} : memref<16x1xf32, #tpu.memory_space<vmem>>, vector<16x1xf32>,
      %c0_41 = arith.constant 0 : index
      %c0_42 = arith.constant 0 : index
      %42 = vector.load %arg11[%c0_41, %c0_42] : memref<16x128xf32, #tpu.memory_space<vmem>>, vector<16x128xf32>
      %cst_43 = arith.constant dense<0xFF800000> : vector<16xf32>
      %43 = vector.multi_reduction <maximumf>, %42, %cst_43 [1] : vector<16x128xf32> to vector<16xf32>
      %44 = vector.shape_cast %43 : vector<16xf32> to vector<16x1xf32>
      %c0_44 = arith.constant 0 : index
      %c0_45 = arith.constant 0 : index
      %45 = vector.load %arg7[%c0_44, %c0_45] : memref<16x1xf32, #tpu.memory_space<vmem>>, vector<16x1xf32>
      tpu.vector_store %arg7[%c0_44, %c0_45], %44 {strides = array<i32>} : memref<16x1xf32, #tpu.memory_space<vmem>>, vector<16x1xf32>,
    } else {
    }
    return
  }
  func.func @transform_0(%arg0: i32, %arg1: i32) -> (i32, i32) {
    %c0_i32 = arith.constant 0 : i32
    return %arg0, %arg1 : i32, i32
  }
  func.func @transform_1(%arg0: i32, %arg1: i32) -> (i32, i32) {
    %c0_i32 = arith.constant 0 : i32
    return %arg0, %arg1 : i32, i32
  }
  func.func @transform_2(%arg0: i32, %arg1: i32) -> (i32, i32) {
    %c0_i32 = arith.constant 0 : i32
    %c0_i32_0 = arith.constant 0 : i32
    return %arg0, %c0_i32 : i32, i32
  }
  func.func @transform_3(%arg0: i32, %arg1: i32) -> (i32, i32) {
    %c0_i32 = arith.constant 0 : i32
    %c0_i32_0 = arith.constant 0 : i32
    return %arg0, %c0_i32 : i32, i32
  }
  func.func @transform_4(%arg0: i32, %arg1: i32) -> (i32, i32) {
    %c0_i32 = arith.constant 0 : i32
    %c0_i32_0 = arith.constant 0 : i32
    return %arg0, %c0_i32 : i32, i32
  }
  func.func @transform_5(%arg0: i32, %arg1: i32) -> (i32, i32) {
    %c0_i32 = arith.constant 0 : i32
    %c0_i32_0 = arith.constant 0 : i32
    return %arg0, %c0_i32 : i32, i32
  }
}

</mosaic_0001>

<bundles_post_ra>
// kernel: channel_attention.1
= control target key start
LH: loop header
LB: loop body
LE: loop exit
PB: predicated region body
PF: predicated region fallthrough
CT: control target
= control target key end

     0   :  { %s724_s18 = smov 0   ;;  %s726_s19 = smov 0   ;;  %s777_s0 = inlined_call_operand.vmem [shape: f32[32,256], index: 0, kind: input, shape index: {}]   ;;  %s778_s1 = inlined_call_operand.vmem [shape: f32[32,256], index: 1, kind: input, shape index: {}]   ;;  %s779_s2 = inlined_call_operand.vmem [shape: f32[32,1], index: 2, kind: output, shape index: {0}]   ;;  %s780_s3 = inlined_call_operand.vmem [shape: f32[32,1], index: 3, kind: output, shape index: {1}]   ;;  %s781_s4 = inlined_call_operand.vmem [shape: f32[32,1], index: 4, kind: output, shape index: {2}]   ;;  %s782_s5 = inlined_call_operand.vmem [shape: f32[32,1], index: 5, kind: output, shape index: {3}]  }
   0x1   :  { %s728_s20 = smov 0  }
   0x2 LB: > { %s28_s21 = sadd.s32 1, %s688_s19  ;;  %p627_p0 = scmp.ge.s32.totalorder %s692_s20, 1  ;;  %s692_s20 = sphi %s728_s20, %s16_s20   ;;  %s688_s19 = sphi %s726_s19, %s784_s19   ;;  %s684_s18 = sphi %s724_s18, %s783_s18  }
   0x3   : > { %p30_p1 = scmp.ge.s32.totalorder %s28_s21, 2  ;;  %p234_p2 = scmp.lt.s32.totalorder %s692_s20, 3 }
   0x5   : > { %s786_s21 = smov (%p30_p1, %s28_s21), 0  ;;  %p235_p3 = pnand %p627_p0, %p234_p2 }
   0x6   : > { %s628_s22 = sshll.u32 (!%p235_p3), %s684_s18, 1 }
   0x7   : > { %238 = sbr.rel (%p235_p3) target bundleno = 170 (0xaa), region = 28  ;;  %p294_p4 = scmp.lt.s32.totalorder (!%p235_p3), %s628_s22, 3 }
   0xc   : > { %s788_s22 = smov (!%p294_p4, %s628_s22), 3  ;;  %vm403_vm0 = vcmask 7168  }
   0xd   : > { %s644_s23 = sshll.u32 %s788_s22, 4  ;;  %s635_s30 = sshll.u32 %s788_s22, 3 }
   0xe   : > { %s301_s26 = scalar_lea.vmem %s777_s0, %s644_s23  ;;  %s313_s29 = scalar_lea.vmem %s778_s1, %s644_s23 }
   0xf   : > { %v361_v0 = vld [vmem:[%s301_s26 + $0x10] sm:$0xff]  ;;  %v373_v1 = vld [vmem:[%s301_s26 + $0x18] sm:$0xff]  ;;  %v360_v2 = vld [vmem:[%s301_s26] sm:$0xff]  ;;  %s320_s8 = scalar_lea.vmem %s779_s2, %s635_s30  ;;  %s332_s11 = scalar_lea.vmem %s781_s4, %s635_s30 }
  0x10   : > { %v377_v3 = vadd.f32 %v373_v1, %v361_v0  ;;  %v372_v4 = vld [vmem:[%s301_s26 + $0x8] sm:$0xff]  ;;  %v363_v5 = vld [vmem:[%s313_s29 + $0x10] sm:$0xff]  ;;  %v375_v6 = vld [vmem:[%s313_s29 + $0x18] sm:$0xff]  ;;  %v381_v15 = vmax.f32 %v361_v0, %v373_v1  ;;  %s338_s14 = scalar_lea.vmem %s782_s5, %s635_s30  ;;  %s326_s17 = scalar_lea.vmem %s780_s3, %s635_s30 }
  0x11   : > { %v376_v7 = vadd.f32 %v372_v4, %v360_v2  ;;  %v362_v8 = vld [vmem:[%s313_s29] sm:$0xff]  ;;  %v374_v9 = vld [vmem:[%s313_s29 + $0x8] sm:$0xff]  ;;  %v379_v10 = vadd.f32 %v375_v6, %v363_v5  ;;  %v380_v13 = vmax.f32 %v360_v2, %v372_v4  ;;  %v383_v14 = vmax.f32 %v363_v5, %v375_v6 }
  0x12   : > { %399 = vadd.xlane.f32.xlu1 %v377_v3  ;;  %v378_v11 = vadd.f32 %v374_v9, %v362_v8  ;;  %v382_v12 = vmax.f32 %v362_v8, %v374_v9 }
  0x13   : > { %397 = vadd.xlane.f32.xlu0 %v376_v7 }
  0x16   : > { %410 = vadd.xlane.f32.xlu1 %v379_v10 }
  0x17   : > { %408 = vadd.xlane.f32.xlu0 %v378_v11 }
  0x1a   : > { %426 = vmax.xlane.f32.xlu1 %v382_v12 }
  0x1b   : > { %418 = vmax.xlane.f32.xlu0 %v380_v13 }
  0x1e   : > { %428 = vmax.xlane.f32.xlu1 %v383_v14 }
  0x1f   : > { %420 = vmax.xlane.f32.xlu0 %v381_v15 }
  0x9b   : > { %v400_v16 = vpop.xlane.xlu1 %399 }
  0x9c   : > { %v402_v17 = vmul.f32 0.00390625, %v400_v16  ;;  %v398_v18 = vpop.xlane.xlu0 %397 }
  0x9d   : > { %v401_v19 = vmul.f32 0.00390625, %v398_v18 }
  0x9e   : > { %405 = vst.msk [vmem:[%s320_s8 + $0x8] sm:$0xff] %vm403_vm0, %v402_v17 }
  0x9f   : > { %404 = vst.msk [vmem:[%s320_s8] sm:$0xff] %vm403_vm0, %v401_v19  ;;  %v411_v20 = vpop.xlane.xlu1 %410 }
  0xa0   : > { %v413_v21 = vmul.f32 0.00390625, %v411_v20  ;;  %v409_v22 = vpop.xlane.xlu0 %408 }
  0xa1   : > { %v412_v23 = vmul.f32 0.00390625, %v409_v22 }
  0xa2   : > { %415 = vst.msk [vmem:[%s332_s11 + $0x8] sm:$0xff] %vm403_vm0, %v413_v21 }
  0xa3   : > { %414 = vst.msk [vmem:[%s332_s11] sm:$0xff] %vm403_vm0, %v412_v23  ;;  %v427_v24 = vpop.xlane.xlu1 %426 }
  0xa4   : > { %430 = vst.msk [vmem:[%s338_s14] sm:$0xff] %vm403_vm0, %v427_v24  ;;  %v419_v25 = vpop.xlane.xlu0 %418 }
  0xa5   : > { %422 = vst.msk [vmem:[%s326_s17] sm:$0xff] %vm403_vm0, %v419_v25 }
  0xa7   : > { %v429_v26 = vpop.xlane.xlu1 %428 }
  0xa8   : > { %431 = vst.msk [vmem:[%s338_s14 + $0x8] sm:$0xff] %vm403_vm0, %v429_v26  ;;  %v421_v27 = vpop.xlane.xlu0 %420 }
  0xa9   : > { %423 = vst.msk [vmem:[%s326_s17 + $0x8] sm:$0xff] %vm403_vm0, %v421_v27 }
  0xaa PF: > { %s16_s20 = sadd.s32 1, %s692_s20   ;;  %s783_s18 = smov %s688_s19 }
  0xab   : > { %p13_p5 = scmp.ge.s32.totalorder %s16_s20, 4   ;;  %s784_s19 = smov %s786_s21 }
  0xad   :  { %15 = sbr.rel (!%p13_p5) target bundleno = 2 (0x2), region = 105 }

</bundles_post_ra>
